<compile_context>
chip_gen: v5e
topology: v5e:2x2
jax: 0.10.0
libtpu: 0.0.40
codegen_flags: <defaults>
</compile_context>

<pallas_src>
import functools

import numpy as np
import jax
import jax.numpy as jnp
from jax import lax
from jax.experimental import pallas as pl
from jax.experimental.pallas import tpu as pltpu


def _round_up(x, m):
    return ((x + m - 1) // m) * m


def _cdiv(a, b):
    return (a + b - 1) // b


def _ranking_params(M):
    # 256-aligned M: full-width MXU passes on v6e/v7x, lane multiple on v5e.
    M_pad = _round_up(max(M, 256), 256)
    # number of low mantissa bits of the packed distance key that hold the index
    idx_bits = max(1, (M_pad - 1).bit_length())
    return M_pad, idx_bits


def _rank_dtype(dtype):
    # bf16 MXU feed for the distance/ranking matmul when inputs are f32
    # (ranking only; gather + normal-equation solve stay f32).
    return jnp.dtype(jnp.bfloat16) if jnp.dtype(dtype) == jnp.dtype(jnp.float32) \
        else jnp.dtype(dtype)


def _mp_kernel(x_ref, db_ref, dbt_ref, dbn_ref, o_ref, *,
               K, lle_percent, TL, M, idx_bits):
    # x_ref  : [TL, N]  frame tile (storage dtype)
    # db_ref : [M,  N]  database, gather orientation (storage dtype, resident)
    # dbt_ref: [N,  M]  database, pre-transposed ranking feed (bf16 for f32 in)
    # dbn_ref: [1,  M]  precomputed ||db||^2 (f32, sentinel rows = 1e30)
    x_raw = x_ref[...]
    db_g = db_ref[...]
    x = x_raw.astype(jnp.float32)

    # ---- pairwise squared distances: ||x||^2 + ||db||^2 - 2 x.db -------------
    # db_T is pre-transposed in the wrapper, so the MXU sees a native
    # [TL,N] x [N,M] contraction (no per-tile relayout of the [M,N] database),
    # and the feed stays bf16 when inputs are f32.
    xn = jnp.sum(x * x, axis=1, keepdims=True)                      # [TL, 1]
    x_rank = x_raw.astype(dbt_ref.dtype)
    xdb = jnp.dot(x_rank, dbt_ref[...],
                  preferred_element_type=jnp.float32)               # [TL, M]
    # +1.0 keeps every key strictly positive & normal, so the f32 bit pattern is
    # monotone in the distance (a constant shift never changes the ordering).
    diss = xn + dbn_ref[...] - 2.0 * xdb + 1.0                      # [TL, M]

    # ---- top-K smallest: ONE cross-lane min per iteration ---------------------
    # Pack (distance, db index) into a single sortable f32 key: the low idx_bits
    # mantissa bits are replaced by the lane (= db row) index, so one min yields
    # both the winner and its index.  Near-ties within 2**idx_bits ULPs resolve
    # to the smallest index (documented divergence from exact f32 ranking).
    lo_mask = (1 << idx_bits) - 1
    hi_mask = -(1 << idx_bits)               # two's-complement ~lo_mask
    iota_m = lax.broadcasted_iota(jnp.int32, (TL, M), 1)
    key = pltpu.bitcast(
        (pltpu.bitcast(diss, jnp.int32) & jnp.int32(hi_mask)) | iota_m,
        jnp.float32)

    onehots = []
    for _ in range(K):
        kmin = jnp.min(key, axis=1, keepdims=True)                  # [TL, 1]
        idx = pltpu.bitcast(kmin, jnp.int32) & jnp.int32(lo_mask)   # [TL, 1]
        sel = iota_m == idx                                         # [TL, M]
        onehots.append(sel.astype(db_g.dtype))                      # exact 0/1
        key = jnp.where(sel, jnp.float32(jnp.inf), key)

    # ---- gather all K neighbours with ONE stacked MXU matmul ------------------
    onehot_stack = jnp.concatenate(onehots, axis=0)                 # [K*TL, M]
    fb_stack = jnp.dot(onehot_stack, db_g,
                       preferred_element_type=jnp.float32)          # [K*TL, N]
    feat_base = [fb_stack[k * TL:(k + 1) * TL] for k in range(K)]

    if K == 1:
        feat_fuse = feat_base[0]
    else:
        Km1 = K - 1
        f0 = feat_base[0]
        B = x - f0                                        # [TL, N]
        A = [feat_base[k + 1] - f0 for k in range(Km1)]   # Km1 x [TL, N]

        # Per-frame normal equations (A^T A) w_ = A^T B; each entry is [TL, 1].
        AtA = [[None] * Km1 for _ in range(Km1)]
        for i in range(Km1):
            for j in range(i, Km1):
                v = jnp.sum(A[i] * A[j], axis=1, keepdims=True)
                AtA[i][j] = v
                AtA[j][i] = v
        AtB = [jnp.sum(A[i] * B, axis=1, keepdims=True) for i in range(Km1)]

        # Tiny relative Tikhonov jitter: duplicate database rows among the K
        # neighbours can make A^T A singular; this keeps the solve finite.
        diag_sum = AtA[0][0]
        for i in range(1, Km1):
            diag_sum = diag_sum + AtA[i][i]
        eps = (1e-6 / Km1) * diag_sum + jnp.float32(1e-20)

        Mm = [[AtA[i][j] for j in range(Km1)] for i in range(Km1)]
        for i in range(Km1):
            Mm[i][i] = Mm[i][i] + eps
        rhs = [AtB[i] for i in range(Km1)]

        # Gauss-Jordan on [TL,1] per-frame scalars (SPD; no pivoting).
        # NOTE: deliberately kept sublane-shaped — per review this is only worth
        # lane-dense repacking if the bundle shows VALU as the binding slot;
        # TL<=128 keeps this section cheap.
        for p_ in range(Km1):
            inv = 1.0 / Mm[p_][p_]
            for j in range(Km1):
                Mm[p_][j] = Mm[p_][j] * inv
            rhs[p_] = rhs[p_] * inv
            for i in range(Km1):
                if i == p_:
                    continue
                f = Mm[i][p_]
                for j in range(Km1):
                    Mm[i][j] = Mm[i][j] - f * Mm[p_][j]
                rhs[i] = rhs[i] - f * rhs[p_]

        wsum = rhs[0]
        for r in rhs[1:]:
            wsum = wsum + r
        w0 = 1.0 - wsum                                   # [TL, 1]

        feat_fuse = w0 * f0
        for k in range(Km1):
            feat_fuse = feat_fuse + rhs[k] * feat_base[k + 1]

    out = x * (1.0 - lle_percent) + feat_fuse * lle_percent
    o_ref[...] = out.astype(o_ref.dtype)


def manifold_projection(audio_features, feature_database, lle_percent, K,
                        tile_l=None):
    """Pallas TPU implementation of ManifoldProjection.forward."""
    x = audio_features
    if x.ndim == 3:
        x = x[0]                      # matches torch .squeeze(0) for batch==1
    L, N = x.shape
    M, N2 = feature_database.shape
    assert N == N2 and 1 <= K <= M

    db = feature_database
    if db.dtype != x.dtype:
        db = db.astype(x.dtype)       # one-time cast outside the kernel

    # Lane/MXU-align the database: pad M with sentinel rows whose precomputed
    # ||db||^2 is huge so they can never win the argmin.
    M_pad, idx_bits = _ranking_params(M)
    dbn = jnp.sum(db.astype(jnp.float32) ** 2, axis=-1)             # [M]
    if M_pad != M:
        db = jnp.concatenate(
            [db, jnp.zeros((M_pad - M, N), db.dtype)], axis=0)
        dbn = jnp.concatenate(
            [dbn, jnp.full((M_pad - M,), 1e30, jnp.float32)], axis=0)
    dbn = dbn.reshape(1, M_pad)

    # One-time transpose (and bf16 cast for f32 inputs) outside the kernel:
    # the in-kernel distance matmul becomes a native [TL,N] x [N,M] dot.
    rank_dt = _rank_dtype(x.dtype)
    db_t = jnp.transpose(db).astype(rank_dt)                        # [N, M_pad]

    # Frame tiling: 8-aligned tiles, default 128 (keeps the live [TL,M]/[TL,N]
    # f32 intermediates close to the 64-vreg file instead of spilling);
    # keep >= 2 grid steps where possible (megacore); pad L instead of asserting.
    if tile_l is None:
        tile_l = 128
    Lp8 = _round_up(max(L, 8), 8)
    tile_l = min(_round_up(tile_l, 8), Lp8)
    n_tiles = max(_cdiv(Lp8, tile_l), 2 if Lp8 >= 16 else 1)
    tile_l = _round_up(_cdiv(Lp8, n_tiles), 8)
    L_pad = tile_l * n_tiles
    if L_pad != L:
        x_in = jnp.concatenate(
            [x, jnp.zeros((L_pad - L, N), x.dtype)], axis=0)
    else:
        x_in = x

    # VMEM budget: generation-aware ceiling at ~85% of the physical per-core
    # VMEM (v5e/v6e 128 MiB, v7x 64 MiB) so the compiler keeps headroom for its
    # own scratch and pipeline buffers.
    it = jnp.dtype(x.dtype).itemsize
    it_r = jnp.dtype(rank_dt).itemsize
    est = (4 * tile_l * N * it                 # x & out tiles (double-buffered)
           + 2 * M_pad * N * it                # resident gather db (2 pipeline bufs)
           + 2 * M_pad * N * it_r              # resident transposed ranking db
           + 4 * M_pad * 4                     # dbn
           + (K + 4) * tile_l * M_pad * 4      # diss / keys / one-hots
           + (2 * K + 6) * tile_l * N * 4)     # fb_stack, A/B, accumulators
    try:
        vmem_cap = int(pltpu.get_tpu_info().vmem_capacity_bytes)
    except Exception:
        vmem_cap = 64 << 20                    # conservative fallback: v7x per-core VMEM
    ceiling = int(0.85 * vmem_cap)
    vmem_bytes = int(min(max(2 * est, 32 << 20), ceiling))

    # TODO(synk): for production-scale databases (M of many thousands) replace
    # the resident-db design with an M-axis streaming top-K (inner "arbitrary"
    # grid axis) so VMEM stays bounded on v7x and the one-hot gather matmul only
    # touches winning tiles.

    kernel = functools.partial(_mp_kernel, K=K,
                               lle_percent=float(lle_percent),
                               TL=tile_l, M=M_pad, idx_bits=idx_bits)
    out = pl.pallas_call(
        kernel,
        out_shape=jax.ShapeDtypeStruct((L_pad, N), x.dtype),
        grid_spec=pltpu.PrefetchScalarGridSpec(
            num_scalar_prefetch=0,
            grid=(n_tiles,),
            in_specs=[
                pl.BlockSpec((tile_l, N), lambda i: (i, 0)),
                # constant index_maps -> fetched once per core, kept resident
                pl.BlockSpec((M_pad, N), lambda i: (0, 0)),
                pl.BlockSpec((N, M_pad), lambda i: (0, 0)),
                pl.BlockSpec((1, M_pad), lambda i: (0, 0)),
            ],
            out_specs=pl.BlockSpec((tile_l, N), lambda i: (i, 0)),
        ),
        compiler_params=pltpu.CompilerParams(
            dimension_semantics=("parallel",),
            vmem_limit_bytes=vmem_bytes),
    )(x_in, db, db_t, dbn)
    return out[:L] if L_pad != L else out


# ----------------------------- reference (test) -----------------------------

def _round_to(a, dtype):
    # round an f32 numpy array through `dtype` (e.g. bf16) and back to f32
    return np.asarray(jnp.asarray(np.asarray(a, np.float32))
                      .astype(dtype).astype(jnp.float32))


def _reference_numpy(x, db, K, p, M_pad, idx_bits, rank_dtype):
    """NumPy emulation of the kernel's documented semantics.

    Ranking uses the same approximations as the kernel (bf16 matmul feeds for
    f32 inputs; (distance, index) packed into one sortable f32 key whose low
    idx_bits bits hold the db index).  Everything after neighbour selection is
    exact f64 — the kernel's f32 solve / tiny Tikhonov jitter differences are
    far below the test tolerance.
    """
    x = np.asarray(x, np.float32)
    db = np.asarray(db, np.float32)
    if x.ndim == 3:
        x = x[0]
    L, _ = x.shape
    M = db.shape[0]

    xr, dbr = _round_to(x, rank_dtype), _round_to(db, rank_dtype)
    xn = (x ** 2).sum(-1)
    dbn = (db ** 2).sum(-1)
    xdb = xr @ dbr.T
    diss = (xn[:, None] + dbn[None, :] - 2.0 * xdb + 1.0).astype(np.float32)

    diss_p = np.full((L, M_pad), np.float32(1e30), np.float32)
    diss_p[:, :M] = diss
    bits = diss_p.view(np.int32)
    key = np.bitwise_or(
        np.bitwise_and(bits, np.int32(-(1 << idx_bits))),
        np.arange(M_pad, dtype=np.int32)[None, :]).view(np.float32).copy()

    ind = np.zeros((L, K), np.int64)
    for k in range(K):
        j = key.argmin(axis=1)
        ind[:, k] = j
        key[np.arange(L), j] = np.inf

    out = np.zeros_like(x)
    for i in range(L):
        fb = db[ind[i]].astype(np.float64)
        xi = x[i].astype(np.float64)
        if K == 1:
            fuse = fb[0]
        else:
            B = xi - fb[0]
            A = (fb[1:] - fb[0]).T
            w_rest = np.linalg.solve(A.T @ A, A.T @ B)
            w = np.concatenate([[1.0 - w_rest.sum()], w_rest])
            fuse = w @ fb
        out[i] = x[i] * (1.0 - p) + fuse * p
    return out.astype(np.float32)


if __name__ == "__main__":
    key = jax.random.PRNGKey(0)
    k1, k2 = jax.random.split(key)

    BS, L, N = 1, 20, 128          # speech representation [BS, L, N]
    M_DB, K = 60, 4                # synthetic feature database [M, N], K-NN
    LLE_PERCENT = 0.5

    audio_features = jax.random.normal(k1, (BS, L, N), dtype=jnp.float32)
    # deterministic stand-in for torch.load(feature_database)
    feature_database = jax.random.normal(k2, (M_DB, N), dtype=jnp.float32)

    out = manifold_projection(audio_features, feature_database,
                              LLE_PERCENT, K)
    out = jax.block_until_ready(out)

    M_pad, idx_bits = _ranking_params(M_DB)
    ref = _reference_numpy(np.asarray(audio_features),
                           np.asarray(feature_database),
                           K, LLE_PERCENT, M_pad, idx_bits,
                           _rank_dtype(jnp.float32))
    np.testing.assert_allclose(np.asarray(out), ref, rtol=2e-3, atol=2e-3)

    print("KERNEL_OK")
</pallas_src>

<mosaic_0001>
module attributes {stable_mosaic.version = 11 : i64} {
  func.func @_mp_kernel(%arg0: i32, %arg1: memref<16x128xf32, #tpu.memory_space<vmem>>, %arg2: memref<256x128xf32, #tpu.memory_space<vmem>>, %arg3: memref<128x256xbf16, #tpu.memory_space<vmem>>, %arg4: memref<1x256xf32, #tpu.memory_space<vmem>>, %arg5: memref<16x128xf32, #tpu.memory_space<vmem>>) attributes {dimension_semantics = [#tpu.dimension_semantics<parallel>], iteration_bounds = array<i64: 2>, scalar_prefetch = 0 : i64, scratch_operands = 0 : i64, tpu.core_type = #tpu.core_type<tc>, window_params = [{transform_indices = @transform_0, window_bounds = array<i64: 16, 128>}, {pipeline_mode = #tpu.pipeline_mode<synchronous>, transform_indices = @transform_1, window_bounds = array<i64: 256, 128>}, {pipeline_mode = #tpu.pipeline_mode<synchronous>, transform_indices = @transform_2, window_bounds = array<i64: 128, 256>}, {pipeline_mode = #tpu.pipeline_mode<synchronous>, transform_indices = @transform_3, window_bounds = array<i64: 1, 256>}, {transform_indices = @transform_4, window_bounds = array<i64: 16, 128>}]} {
    %c0 = arith.constant 0 : index
    %c0_0 = arith.constant 0 : index
    %0 = vector.load %arg1[%c0, %c0_0] : memref<16x128xf32, #tpu.memory_space<vmem>>, vector<16x128xf32>
    %c0_1 = arith.constant 0 : index
    %c0_2 = arith.constant 0 : index
    %1 = vector.load %arg2[%c0_1, %c0_2] : memref<256x128xf32, #tpu.memory_space<vmem>>, vector<256x128xf32>
    %2 = arith.mulf %0, %0 : vector<16x128xf32>
    %cst = arith.constant dense<0.000000e+00> : vector<16xf32>
    %3 = vector.multi_reduction <add>, %2, %cst [1] : vector<16x128xf32> to vector<16xf32>
    %4 = vector.shape_cast %3 : vector<16xf32> to vector<16x1xf32>
    %5 = arith.truncf %0 : vector<16x128xf32> to vector<16x128xbf16>
    %c0_3 = arith.constant 0 : index
    %c0_4 = arith.constant 0 : index
    %6 = vector.load %arg3[%c0_3, %c0_4] : memref<128x256xbf16, #tpu.memory_space<vmem>>, vector<128x256xbf16>
    %cst_5 = arith.constant dense<0.000000e+00> : vector<16x256xf32>
    %7 = tpu.matmul %5, %6, %cst_5 {dimension_numbers = #tpu.dot_dimension_numbers<[1], [0], [0], [1], [0, 0, 1, 1], [], []>} : vector<16x128xbf16>, vector<128x256xbf16>, vector<16x256xf32> -> vector<16x256xf32>
    %c0_6 = arith.constant 0 : index
    %c0_7 = arith.constant 0 : index
    %8 = vector.load %arg4[%c0_6, %c0_7] : memref<1x256xf32, #tpu.memory_space<vmem>>, vector<1x256xf32>
    %9 = vector.broadcast %4 : vector<16x1xf32> to vector<16x256xf32>
    %10 = vector.broadcast %8 : vector<1x256xf32> to vector<16x256xf32>
    %11 = arith.addf %9, %10 : vector<16x256xf32>
    %cst_8 = arith.constant 2.000000e+00 : f32
    %12 = vector.broadcast %cst_8 : f32 to vector<16x256xf32>
    %13 = arith.mulf %12, %7 : vector<16x256xf32>
    %14 = arith.subf %11, %13 : vector<16x256xf32>
    %cst_9 = arith.constant 1.000000e+00 : f32
    %15 = vector.broadcast %cst_9 : f32 to vector<16x256xf32>
    %16 = arith.addf %14, %15 : vector<16x256xf32>
    %17 = tpu.iota {dimensions = array<i32: 1>} : vector<16x256xi32>
    %18 = tpu.bitcast %16 : vector<16x256xf32> -> vector<16x256xi32>
    %c-256_i32 = arith.constant -256 : i32
    %19 = vector.broadcast %c-256_i32 : i32 to vector<16x256xi32>
    %20 = arith.andi %18, %19 : vector<16x256xi32>
    %21 = arith.ori %20, %17 : vector<16x256xi32>
    %22 = tpu.bitcast %21 : vector<16x256xi32> -> vector<16x256xf32>
    %cst_10 = arith.constant dense<0x7F800000> : vector<16xf32>
    %23 = vector.multi_reduction <minimumf>, %22, %cst_10 [1] : vector<16x256xf32> to vector<16xf32>
    %24 = vector.shape_cast %23 : vector<16xf32> to vector<16x1xf32>
    %25 = tpu.bitcast %24 : vector<16x1xf32> -> vector<16x1xi32>
    %c255_i32 = arith.constant 255 : i32
    %26 = vector.broadcast %c255_i32 : i32 to vector<16x1xi32>
    %27 = arith.andi %25, %26 : vector<16x1xi32>
    %28 = vector.broadcast %27 : vector<16x1xi32> to vector<16x256xi32>
    %29 = arith.cmpi eq, %17, %28 : vector<16x256xi32>
    %30 = arith.extui %29 : vector<16x256xi1> to vector<16x256xi32>
    %31 = arith.sitofp %30 : vector<16x256xi32> to vector<16x256xf32>
    %cst_11 = arith.constant 0x7F800000 : f32
    %32 = vector.broadcast %cst_11 : f32 to vector<16x256xf32>
    %33 = arith.select %29, %32, %22 : vector<16x256xi1>, vector<16x256xf32>
    %cst_12 = arith.constant dense<0x7F800000> : vector<16xf32>
    %34 = vector.multi_reduction <minimumf>, %33, %cst_12 [1] : vector<16x256xf32> to vector<16xf32>
    %35 = vector.shape_cast %34 : vector<16xf32> to vector<16x1xf32>
    %36 = tpu.bitcast %35 : vector<16x1xf32> -> vector<16x1xi32>
    %c255_i32_13 = arith.constant 255 : i32
    %37 = vector.broadcast %c255_i32_13 : i32 to vector<16x1xi32>
    %38 = arith.andi %36, %37 : vector<16x1xi32>
    %39 = vector.broadcast %38 : vector<16x1xi32> to vector<16x256xi32>
    %40 = arith.cmpi eq, %17, %39 : vector<16x256xi32>
    %41 = arith.extui %40 : vector<16x256xi1> to vector<16x256xi32>
    %42 = arith.sitofp %41 : vector<16x256xi32> to vector<16x256xf32>
    %cst_14 = arith.constant 0x7F800000 : f32
    %43 = vector.broadcast %cst_14 : f32 to vector<16x256xf32>
    %44 = arith.select %40, %43, %33 : vector<16x256xi1>, vector<16x256xf32>
    %cst_15 = arith.constant dense<0x7F800000> : vector<16xf32>
    %45 = vector.multi_reduction <minimumf>, %44, %cst_15 [1] : vector<16x256xf32> to vector<16xf32>
    %46 = vector.shape_cast %45 : vector<16xf32> to vector<16x1xf32>
    %47 = tpu.bitcast %46 : vector<16x1xf32> -> vector<16x1xi32>
    %c255_i32_16 = arith.constant 255 : i32
    %48 = vector.broadcast %c255_i32_16 : i32 to vector<16x1xi32>
    %49 = arith.andi %47, %48 : vector<16x1xi32>
    %50 = vector.broadcast %49 : vector<16x1xi32> to vector<16x256xi32>
    %51 = arith.cmpi eq, %17, %50 : vector<16x256xi32>
    %52 = arith.extui %51 : vector<16x256xi1> to vector<16x256xi32>
    %53 = arith.sitofp %52 : vector<16x256xi32> to vector<16x256xf32>
    %cst_17 = arith.constant 0x7F800000 : f32
    %54 = vector.broadcast %cst_17 : f32 to vector<16x256xf32>
    %55 = arith.select %51, %54, %44 : vector<16x256xi1>, vector<16x256xf32>
    %cst_18 = arith.constant dense<0x7F800000> : vector<16xf32>
    %56 = vector.multi_reduction <minimumf>, %55, %cst_18 [1] : vector<16x256xf32> to vector<16xf32>
    %57 = vector.shape_cast %56 : vector<16xf32> to vector<16x1xf32>
    %58 = tpu.bitcast %57 : vector<16x1xf32> -> vector<16x1xi32>
    %c255_i32_19 = arith.constant 255 : i32
    %59 = vector.broadcast %c255_i32_19 : i32 to vector<16x1xi32>
    %60 = arith.andi %58, %59 : vector<16x1xi32>
    %61 = vector.broadcast %60 : vector<16x1xi32> to vector<16x256xi32>
    %62 = arith.cmpi eq, %17, %61 : vector<16x256xi32>
    %63 = arith.extui %62 : vector<16x256xi1> to vector<16x256xi32>
    %64 = arith.sitofp %63 : vector<16x256xi32> to vector<16x256xf32>
    %65 = tpu.concatenate %31, %42, %53, %64 in 0 : vector<16x256xf32>, vector<16x256xf32>, vector<16x256xf32>, vector<16x256xf32> -> vector<64x256xf32>
    %cst_20 = arith.constant dense<0.000000e+00> : vector<64x128xf32>
    %66 = tpu.matmul %65, %1, %cst_20 {dimension_numbers = #tpu.dot_dimension_numbers<[1], [0], [0], [1], [0, 0, 1, 1], [], []>} : vector<64x256xf32>, vector<256x128xf32>, vector<64x128xf32> -> vector<64x128xf32>
    %67 = vector.extract_strided_slice %66 {offsets = [0, 0], sizes = [16, 128], strides = [1, 1]} : vector<64x128xf32> to vector<16x128xf32>
    %68 = vector.extract_strided_slice %66 {offsets = [16, 0], sizes = [16, 128], strides = [1, 1]} : vector<64x128xf32> to vector<16x128xf32>
    %69 = vector.extract_strided_slice %66 {offsets = [32, 0], sizes = [16, 128], strides = [1, 1]} : vector<64x128xf32> to vector<16x128xf32>
    %70 = vector.extract_strided_slice %66 {offsets = [48, 0], sizes = [16, 128], strides = [1, 1]} : vector<64x128xf32> to vector<16x128xf32>
    %71 = arith.subf %0, %67 : vector<16x128xf32>
    %72 = arith.subf %68, %67 : vector<16x128xf32>
    %73 = arith.subf %69, %67 : vector<16x128xf32>
    %74 = arith.subf %70, %67 : vector<16x128xf32>
    %75 = arith.mulf %72, %72 : vector<16x128xf32>
    %cst_21 = arith.constant dense<0.000000e+00> : vector<16xf32>
    %76 = vector.multi_reduction <add>, %75, %cst_21 [1] : vector<16x128xf32> to vector<16xf32>
    %77 = vector.shape_cast %76 : vector<16xf32> to vector<16x1xf32>
    %78 = arith.mulf %72, %73 : vector<16x128xf32>
    %cst_22 = arith.constant dense<0.000000e+00> : vector<16xf32>
    %79 = vector.multi_reduction <add>, %78, %cst_22 [1] : vector<16x128xf32> to vector<16xf32>
    %80 = vector.shape_cast %79 : vector<16xf32> to vector<16x1xf32>
    %81 = arith.mulf %72, %74 : vector<16x128xf32>
    %cst_23 = arith.constant dense<0.000000e+00> : vector<16xf32>
    %82 = vector.multi_reduction <add>, %81, %cst_23 [1] : vector<16x128xf32> to vector<16xf32>
    %83 = vector.shape_cast %82 : vector<16xf32> to vector<16x1xf32>
    %84 = arith.mulf %73, %73 : vector<16x128xf32>
    %cst_24 = arith.constant dense<0.000000e+00> : vector<16xf32>
    %85 = vector.multi_reduction <add>, %84, %cst_24 [1] : vector<16x128xf32> to vector<16xf32>
    %86 = vector.shape_cast %85 : vector<16xf32> to vector<16x1xf32>
    %87 = arith.mulf %73, %74 : vector<16x128xf32>
    %cst_25 = arith.constant dense<0.000000e+00> : vector<16xf32>
    %88 = vector.multi_reduction <add>, %87, %cst_25 [1] : vector<16x128xf32> to vector<16xf32>
    %89 = vector.shape_cast %88 : vector<16xf32> to vector<16x1xf32>
    %90 = arith.mulf %74, %74 : vector<16x128xf32>
    %cst_26 = arith.constant dense<0.000000e+00> : vector<16xf32>
    %91 = vector.multi_reduction <add>, %90, %cst_26 [1] : vector<16x128xf32> to vector<16xf32>
    %92 = vector.shape_cast %91 : vector<16xf32> to vector<16x1xf32>
    %93 = arith.mulf %72, %71 : vector<16x128xf32>
    %cst_27 = arith.constant dense<0.000000e+00> : vector<16xf32>
    %94 = vector.multi_reduction <add>, %93, %cst_27 [1] : vector<16x128xf32> to vector<16xf32>
    %95 = vector.shape_cast %94 : vector<16xf32> to vector<16x1xf32>
    %96 = arith.mulf %73, %71 : vector<16x128xf32>
    %cst_28 = arith.constant dense<0.000000e+00> : vector<16xf32>
    %97 = vector.multi_reduction <add>, %96, %cst_28 [1] : vector<16x128xf32> to vector<16xf32>
    %98 = vector.shape_cast %97 : vector<16xf32> to vector<16x1xf32>
    %99 = arith.mulf %74, %71 : vector<16x128xf32>
    %cst_29 = arith.constant dense<0.000000e+00> : vector<16xf32>
    %100 = vector.multi_reduction <add>, %99, %cst_29 [1] : vector<16x128xf32> to vector<16xf32>
    %101 = vector.shape_cast %100 : vector<16xf32> to vector<16x1xf32>
    %102 = arith.addf %77, %86 : vector<16x1xf32>
    %103 = arith.addf %102, %92 : vector<16x1xf32>
    %cst_30 = arith.constant 3.33333332E-7 : f32
    %104 = vector.broadcast %cst_30 : f32 to vector<16x1xf32>
    %105 = arith.mulf %104, %103 : vector<16x1xf32>
    %cst_31 = arith.constant 9.99999968E-21 : f32
    %106 = vector.broadcast %cst_31 : f32 to vector<16x1xf32>
    %107 = arith.addf %105, %106 : vector<16x1xf32>
    %108 = arith.addf %77, %107 : vector<16x1xf32>
    %109 = arith.addf %86, %107 : vector<16x1xf32>
    %110 = arith.addf %92, %107 : vector<16x1xf32>
    %cst_32 = arith.constant 1.000000e+00 : f32
    %111 = vector.broadcast %cst_32 : f32 to vector<16x1xf32>
    %112 = arith.divf %111, %108 : vector<16x1xf32>
    %113 = arith.mulf %80, %112 : vector<16x1xf32>
    %114 = arith.mulf %83, %112 : vector<16x1xf32>
    %115 = arith.mulf %95, %112 : vector<16x1xf32>
    %116 = arith.mulf %80, %113 : vector<16x1xf32>
    %117 = arith.subf %109, %116 : vector<16x1xf32>
    %118 = arith.mulf %80, %114 : vector<16x1xf32>
    %119 = arith.subf %89, %118 : vector<16x1xf32>
    %120 = arith.mulf %80, %115 : vector<16x1xf32>
    %121 = arith.subf %98, %120 : vector<16x1xf32>
    %122 = arith.mulf %83, %113 : vector<16x1xf32>
    %123 = arith.subf %89, %122 : vector<16x1xf32>
    %124 = arith.mulf %83, %114 : vector<16x1xf32>
    %125 = arith.subf %110, %124 : vector<16x1xf32>
    %126 = arith.mulf %83, %115 : vector<16x1xf32>
    %127 = arith.subf %101, %126 : vector<16x1xf32>
    %cst_33 = arith.constant 1.000000e+00 : f32
    %128 = vector.broadcast %cst_33 : f32 to vector<16x1xf32>
    %129 = arith.divf %128, %117 : vector<16x1xf32>
    %130 = arith.mulf %119, %129 : vector<16x1xf32>
    %131 = arith.mulf %121, %129 : vector<16x1xf32>
    %132 = arith.mulf %113, %130 : vector<16x1xf32>
    %133 = arith.subf %114, %132 : vector<16x1xf32>
    %134 = arith.mulf %113, %131 : vector<16x1xf32>
    %135 = arith.subf %115, %134 : vector<16x1xf32>
    %136 = arith.mulf %123, %130 : vector<16x1xf32>
    %137 = arith.subf %125, %136 : vector<16x1xf32>
    %138 = arith.mulf %123, %131 : vector<16x1xf32>
    %139 = arith.subf %127, %138 : vector<16x1xf32>
    %cst_34 = arith.constant 1.000000e+00 : f32
    %140 = vector.broadcast %cst_34 : f32 to vector<16x1xf32>
    %141 = arith.divf %140, %137 : vector<16x1xf32>
    %142 = arith.mulf %139, %141 : vector<16x1xf32>
    %143 = arith.mulf %133, %142 : vector<16x1xf32>
    %144 = arith.subf %135, %143 : vector<16x1xf32>
    %145 = arith.mulf %130, %142 : vector<16x1xf32>
    %146 = arith.subf %131, %145 : vector<16x1xf32>
    %147 = arith.addf %144, %146 : vector<16x1xf32>
    %148 = arith.addf %147, %142 : vector<16x1xf32>
    %cst_35 = arith.constant 1.000000e+00 : f32
    %149 = vector.broadcast %cst_35 : f32 to vector<16x1xf32>
    %150 = arith.subf %149, %148 : vector<16x1xf32>
    %151 = vector.broadcast %150 : vector<16x1xf32> to vector<16x128xf32>
    %152 = arith.mulf %151, %67 : vector<16x128xf32>
    %153 = vector.broadcast %144 : vector<16x1xf32> to vector<16x128xf32>
    %154 = arith.mulf %153, %68 : vector<16x128xf32>
    %155 = arith.addf %152, %154 : vector<16x128xf32>
    %156 = vector.broadcast %146 : vector<16x1xf32> to vector<16x128xf32>
    %157 = arith.mulf %156, %69 : vector<16x128xf32>
    %158 = arith.addf %155, %157 : vector<16x128xf32>
    %159 = vector.broadcast %142 : vector<16x1xf32> to vector<16x128xf32>
    %160 = arith.mulf %159, %70 : vector<16x128xf32>
    %161 = arith.addf %158, %160 : vector<16x128xf32>
    %cst_36 = arith.constant 5.000000e-01 : f32
    %162 = vector.broadcast %cst_36 : f32 to vector<16x128xf32>
    %163 = arith.mulf %0, %162 : vector<16x128xf32>
    %cst_37 = arith.constant 5.000000e-01 : f32
    %164 = vector.broadcast %cst_37 : f32 to vector<16x128xf32>
    %165 = arith.mulf %161, %164 : vector<16x128xf32>
    %166 = arith.addf %163, %165 : vector<16x128xf32>
    %c0_38 = arith.constant 0 : index
    %c0_39 = arith.constant 0 : index
    %167 = vector.load %arg5[%c0_38, %c0_39] : memref<16x128xf32, #tpu.memory_space<vmem>>, vector<16x128xf32>
    tpu.vector_store %arg5[%c0_38, %c0_39], %166 {strides = array<i32>} : memref<16x128xf32, #tpu.memory_space<vmem>>, vector<16x128xf32>,
    return
  }
  func.func @transform_0(%arg0: i32) -> (i32, i32) {
    %c0_i32 = arith.constant 0 : i32
    %c0_i32_0 = arith.constant 0 : i32
    return %arg0, %c0_i32 : i32, i32
  }
  func.func @transform_1(%arg0: i32) -> (i32, i32) {
    %c0_i32 = arith.constant 0 : i32
    %c0_i32_0 = arith.constant 0 : i32
    %c0_i32_1 = arith.constant 0 : i32
    return %c0_i32, %c0_i32_0 : i32, i32
  }
  func.func @transform_2(%arg0: i32) -> (i32, i32) {
    %c0_i32 = arith.constant 0 : i32
    %c0_i32_0 = arith.constant 0 : i32
    %c0_i32_1 = arith.constant 0 : i32
    return %c0_i32, %c0_i32_0 : i32, i32
  }
  func.func @transform_3(%arg0: i32) -> (i32, i32) {
    %c0_i32 = arith.constant 0 : i32
    %c0_i32_0 = arith.constant 0 : i32
    %c0_i32_1 = arith.constant 0 : i32
    return %c0_i32, %c0_i32_0 : i32, i32
  }
  func.func @transform_4(%arg0: i32) -> (i32, i32) {
    %c0_i32 = arith.constant 0 : i32
    %c0_i32_0 = arith.constant 0 : i32
    return %arg0, %c0_i32 : i32, i32
  }
}

</mosaic_0001>

<bundles_post_ra>
// kernel: tpu_custom_call.1
= control target key start
LH: loop header
LB: loop body
LE: loop exit
PB: predicated region body
PF: predicated region fallthrough
CT: control target
= control target key end

     0   :  { %9 = vsyncpa [#allocation3], 0  ;;  %s1799_s0 = inlined_call_operand.hbm [shape: f32[32,128], index: 0, kind: input, shape index: {}]   ;;  %s1800_s1 = inlined_call_operand.hbm [shape: f32[256,128], index: 1, kind: input, shape index: {}]   ;;  %s1801_s2 = inlined_call_operand.hbm [shape: bf16[128,256], index: 2, kind: input, shape index: {}]   ;;  %s1802_s3 = inlined_call_operand.vmem [shape: f32[1,256], index: 3, kind: input, shape index: {}]   ;;  %s1803_s4 = inlined_call_operand.hbm [shape: f32[32,128], index: 4, kind: output, shape index: {}]  }
   0x1   :  { %11 = vsyncpa [#allocation3 + $0x1], 0 }
   0x2   :  { %12 = vsyncpa [#allocation6], 0 }
   0x3   :  { %13 = vsyncpa [#allocation4], 0 }
   0x4   :  { %15 = vsyncpa [#allocation4 + $0x1], 0  ;;  %s1447_s15 = smov 0   ;;  %s1449_s16 = smov 0  }
   0x5   :  { %s1451_s17 = smov 0   ;;  %s1453_s18 = smov 0  }
   0x6 LB: > { %s1468_s19 = sadd.s32 4294967295, %s1413_s18   ;;  %s1003_s20 = sadd.s32 4294967294, %s1413_s18   ;;  %s1413_s18 = sphi %s1453_s18, %s1813_s18   ;;  %s1409_s17 = sphi %s1451_s17, %s1812_s17   ;;  %s1405_s16 = sphi %s1449_s16, %s1811_s16   ;;  %s1401_s15 = sphi %s1447_s15, %s1810_s15  }
   0x7   : > { %p41_p0 = scmp.ne.s32.totalorder %s1405_s16, %s1401_s15  ;;  %p42_p1 = scmp.eq.s32.totalorder %s1468_s19, 0 }
   0x8   : > { %p128_p2 = scmp.eq.s32.totalorder %s1468_s19, 1  ;;  %p134_p3 = scmp.eq.s32.totalorder %s1003_s20, 1 }
   0x9   : > { %p1477_p4 = por %p42_p1, %p41_p0  ;;  %p1004_p5 = scmp.ge.s32.totalorder %s1413_s18, 1 }
   0xa   : > { %p1482_p6 = por %p134_p3, %p41_p0  ;;  %p141_p7 = scmp.lt.s32.totalorder %s1413_s18, 3 }
   0xb   : > { %s152_s25 = sshll.u32 %s1800_s1, 4  ;;  %s1415_s27 = smov [#allocation5]   ;;  %s153_s25 = int_to_ptr.hbm [resolvable:$true] %s152_s25 }
   0xc   : > { %p1490_p8 = pnand %p1004_p5, %p141_p7  ;;  %s154_s28 = sshll.u32 %s1415_s27, 4  ;;  %s155_s28 = int_to_ptr.vmem [resolvable:$true] %s154_s28 }
   0xd   : > { %s166_s5 = sshll.u32 %s1801_s2, 4  ;;  %s1416_s6 = smov 128   ;;  %s167_s5 = int_to_ptr.hbm [resolvable:$true] %s166_s5 }
   0xe   : > { %p1179_p9 = pneg %p1490_p8  ;;  %s1417_s7 = smov 8  }
   0xf   : > { %s1418_s8 = smov [#allocation7]   ;;  %s1509_s10 = sadd.s32 1, %s1413_s18  }
  0x10   : > { %p1180_p10 = pnand %p1179_p9, %p42_p1  ;;  %s168_s9 = sshll.u32 %s1418_s8, 4  ;;  %s169_s9 = int_to_ptr.vmem [resolvable:$true] %s168_s9 }
  0x11   : > { %s28_s11 = sadd.s32 1, %s1409_s17  ;;  %s25_s12 = ssub.s32 %s1413_s18, %s1509_s10 }
  0x12   : > { %1182 = dma.hbm_to_vmem [thread:$0]  (!%p1180_p10), %s153_s25, 4096, %s155_s28, [#allocation6], %s1416_s6, %s1416_s6, %s1417_s7  }
  0x13   : > { %1185 = dma.hbm_to_vmem [thread:$0]  (!%p1180_p10), %s167_s5, 2048, %s169_s9, [#allocation6], %s1416_s6, %s1416_s6, %s1417_s7  }
  0x14   : > { %p35_p12 = scmp.ne.s32.totalorder %s1409_s17, %s1405_s16  ;;  %p26_p13 = scmp.eq.s32.totalorder %s25_s12, 0 }
  0x15   : > { %p36_p0 = scmp.eq.s32.totalorder %s1413_s18, 0  ;;  %p1196_p5 = scmp.lt.s32.totalorder %s1413_s18, 2 }
  0x16   : > { %p1519_p3 = por %p128_p2, %p35_p12  ;;  %s185_s20 = sand.u32 1, %s1409_s17  }
  0x17   : > { %s1525_s14 = scalar_select %p26_p13, %s1409_s17, %s28_s11  }
  0x18   : > { %p37_p7 = por %p36_p0, %p35_p12  ;;  %s1008_s23 = sshll.u32 %s185_s20, 4 }
  0x19   : > { %s1117_s24 = sshll.u32 %s1413_s18, 4  ;;  %s189_s29 = scalar_lea.vmem [#allocation2], %s1008_s23 }
  0x1a   : > { %s194_s28 = scalar_lea.hbm %s1799_s0, %s1117_s24  ;;  %s197_s30 = sshll.u32 %s189_s29, 4  ;;  %s198_s30 = int_to_ptr.vmem [resolvable:$true] %s197_s30 }
  0x1b   : > { %s195_s5 = sshll.u32 %s194_s28, 4  ;;  %p1532_p2 = pnand %p1196_p5, %p37_p7  ;;  %s196_s5 = int_to_ptr.hbm [resolvable:$true] %s195_s5 }
  0x1c   : > { %s186_s9 = scalar_lea.sflag [#allocation3], %s185_s20  ;;  %s1313_s11 = sshra.s32 %s196_s5, 4  ;;  %s1314_s11 = int_to_ptr.hbm [resolvable:$true] %s1313_s11 }
  0x1d   : > { %s1315_s12 = scalar_lea.hbm %s1314_s11, 16  ;;  %p1317_p10 = pneg %p1532_p2 }
  0x1e   : > { %p1316_p9 = scmp.ne.s32.totalorder %s1314_s11, %s1315_s12  ;;  %s1320_s25 = scalar_lea.hbm %s1799_s0, 32 }
  0x1f   : > { %p1321_p0 = scmp.lt.s32.totalorder %s1314_s11, %s1799_s0  ;;  %p1322_p5 = scmp.lt.s32.totalorder %s1320_s25, %s1315_s12 }
  0x20   : > { %p1318_p12 = pnand %p1317_p10, %p1316_p9 }
  0x21   : > { %p1323_p7 = por %p1322_p5, %p1321_p0 }
  0x22   : > { %p1319_p13 = pneg %p1318_p12 }
  0x24   : > { %p1324_p11 = pnand %p1323_p7, %p1319_p13 }
  0x26   : > { %1327 = shalt.err (!%p1324_p11)
}
  0x27   : > { %1189 = dma.hbm_to_vmem [thread:$0]  (!%p1532_p2), %s196_s5, 256, %s198_s30, %s186_s9, %s1416_s6, %s1416_s6, %s1417_s7  }
  0x28   : > { %209 = sbr.rel (%p1490_p8) target bundleno = 1067 (0x42b), region = 36  ;;  %s1552_s20 = sand.u32 (!%p1490_p8), 1, %s1405_s16  }
  0x29   : > { %s1012_s29 = sshll.u32 (!%p1490_p8), %s1552_s20, 4  ;;  %s212_s11 = scalar_lea.sflag (!%p1490_p8), [#allocation3], %s1552_s20 }
  0x2a   : > { %s1558_s12 = scalar_lea.vmem (!%p1490_p8), [#allocation2], %s1012_s29 }
  0x2d   : > { %1388 = dma.done.wait (%p1477_p4), %s212_s11, 256  }
  0x2e   : > { %1390 = vsyncadd (%p1477_p4), %s212_s11, 4294967040 }
  0x2f   : > { %1392 = dma.done.wait (%p42_p1), [#allocation6], 6144  }
  0x30   : > { %1394 = vsyncadd (%p42_p1), [#allocation6], 4294961152  ;;  %v1074_v0 = vld [vmem:[#allocation7 + $0x70] sm:$0xf]  ;;  %v1133_v1 = vld [vmem:[#allocation7 + $0x74] sm:$0xf0] }
  0x31   : > { %v1132_v2 = vld [vmem:[#allocation7 + $0x74] sm:$0xf]  ;;  %v1075_v3 = vor.u32 %v1133_v1, %v1074_v0  ;;  %v1076_v4 = vld [vmem:[#allocation7 + $0x78] sm:$0xf0]  ;;  %v1066_v5 = vld [vmem:[#allocation7 + $0x60] sm:$0xf] }
  0x32   : > { %v1131_v6 = vld [vmem:[#allocation7 + $0x64] sm:$0xf0]  ;;  %v1079_v7 = vor.u32 %v1132_v2, %v1076_v4  ;;  %v1130_v8 = vld [vmem:[#allocation7 + $0x64] sm:$0xf]  ;;  %v1068_v9 = vld [vmem:[#allocation7 + $0x68] sm:$0xf0] }
  0x33   : > { %390 = vmatpush.bf16.msra.mxu0 %v1075_v3  ;;  %v1067_v10 = vor.u32 %v1131_v6, %v1066_v5  ;;  %v1071_v11 = vor.u32 %v1130_v8, %v1068_v9  ;;  %v1058_v12 = vld [vmem:[#allocation7 + $0x50] sm:$0xf]  ;;  %v1129_v13 = vld [vmem:[#allocation7 + $0x54] sm:$0xf0]  ;;  %v1128_v14 = vld [vmem:[#allocation7 + $0x54] sm:$0xf]  ;;  %v440_v3 = vlaneseq }
  0x34   : > { %404 = vmatpush.bf16.msra.mxu1 %v1079_v7  ;;  %v1060_v15 = vld [vmem:[#allocation7 + $0x58] sm:$0xf0]  ;;  %v1059_v16 = vor.u32 %v1129_v13, %v1058_v12  ;;  %v1050_v18 = vld [vmem:[#allocation7 + $0x40] sm:$0xf]  ;;  %v1127_v19 = vld [vmem:[#allocation7 + $0x44] sm:$0xf0] }
  0x35   : > { %v1063_v17 = vor.u32 %v1128_v14, %v1060_v15  ;;  %v1126_v20 = vld [vmem:[#allocation7 + $0x44] sm:$0xf]  ;;  %v1052_v21 = vld [vmem:[#allocation7 + $0x48] sm:$0xf0]  ;;  %v1051_v23 = vor.u32 %v1127_v19, %v1050_v18  ;;  %v1042_v26 = vld [vmem:[#allocation7 + $0x30] sm:$0xf] }
  0x36   : > { %v1569_v22 = vld [vmem:[%s1558_s12] sm:$0xff]  ;;  %v1055_v25 = vor.u32 %v1126_v20, %v1052_v21  ;;  %v1125_v27 = vld [vmem:[#allocation7 + $0x34] sm:$0xf0]  ;;  %v1044_v29 = vld [vmem:[#allocation7 + $0x38] sm:$0xf0]  ;;  %v1587_v14 = vand.u32 127, %v440_v3 }
  0x37   : > { %391 = vmatpush.bf16.msra.mxu0 %v1067_v10  ;;  %v287_v24 = vmul.f32 %v1569_v22, %v1569_v22  ;;  %v1124_v28 = vld [vmem:[#allocation7 + $0x34] sm:$0xf]  ;;  %v1043_v30 = vor.u32 %v1125_v27, %v1042_v26  ;;  %v1034_v32 = vld [vmem:[#allocation7 + $0x20] sm:$0xf]  ;;  %v1123_v33 = vld [vmem:[#allocation7 + $0x24] sm:$0xf0] }
  0x38   : > { %405 = vmatpush.bf16.msra.mxu1 %v1071_v11  ;;  %v1047_v31 = vor.u32 %v1124_v28, %v1044_v29  ;;  %v1574_v34 = vld [vmem:[%s1558_s12 + $0x8] sm:$0xff]  ;;  %v1122_v35 = vld [vmem:[#allocation7 + $0x24] sm:$0xf]  ;;  %v1035_v38 = vor.u32 %v1123_v33, %v1034_v32  ;;  %v1026_v40 = vld [vmem:[#allocation7 + $0x10] sm:$0xf]  ;;  %s1134_s6 = sshll.u32 %s1468_s19, 4 }
  0x39   : > { %289 = vadd.xlane.f32.xlu0 %v287_v24  ;;  %v1036_v36 = vld [vmem:[#allocation7 + $0x28] sm:$0xf0]  ;;  %v288_v37 = vmul.f32 %v1574_v34, %v1574_v34  ;;  %v1121_v41 = vld [vmem:[#allocation7 + $0x14] sm:$0xf0]  ;;  %v1120_v42 = vld [vmem:[#allocation7 + $0x14] sm:$0xf]  ;;  %v293_v52 = vpack.c.bf16 %v1574_v34, %v1569_v22  ;;  %s907_s5 = scalar_lea.hbm %s1803_s4, %s1134_s6 }
  0x3a   : > { %v1039_v39 = vor.u32 %v1122_v35, %v1036_v36  ;;  %v1028_v43 = vld [vmem:[#allocation7 + $0x18] sm:$0xf0]  ;;  %v1027_v44 = vor.u32 %v1121_v41, %v1026_v40  ;;  %v1018_v46 = vld [vmem:[#allocation7] sm:$0xf]  ;;  %v1119_v47 = vld [vmem:[#allocation7 + $0x4] sm:$0xf0] }
  0x3b   : > { %392 = vmatpush.bf16.msra.mxu0 %v1059_v16  ;;  %v1031_v45 = vor.u32 %v1120_v42, %v1028_v43  ;;  %v1118_v48 = vld [vmem:[#allocation7 + $0x4] sm:$0xf]  ;;  %v1020_v49 = vld [vmem:[#allocation7 + $0x8] sm:$0xf0]  ;;  %v1019_v50 = vor.u32 %v1119_v47, %v1018_v46  ;;  %v270_v53 = vld [vmem:[#allocation5 + $0x78] sm:$0xff]  ;;  %s250_s8 = scalar_lea.vmem [#allocation8], %s1012_s29 }
  0x3c   : > { %406 = vmatpush.bf16.msra.mxu1 %v1063_v17  ;;  %v1023_v51 = vor.u32 %v1118_v48, %v1020_v49  ;;  %v286_v54 = vld [vmem:[#allocation5 + $0xf8] sm:$0xff]  ;;  %v269_v55 = vld [vmem:[#allocation5 + $0x70] sm:$0xff]  ;;  %v1583_v57 = vld [vmem:[%s1802_s3] sm:$0x3]  ;;  %1135 = vmatpush.msra.mxu2 %v270_v53  ;;  %s908_s19 = sshll.u32 %s250_s8, 4  ;;  %s910_s9 = sshll.u32 %s907_s5, 4  ;;  %s909_s19 = int_to_ptr.vmem [resolvable:$true] %s908_s19  ;;  %s911_s9 = int_to_ptr.hbm [resolvable:$true] %s910_s9 }
  0x3d   : > { %v285_v56 = vld [vmem:[#allocation5 + $0xf0] sm:$0xff]  ;;  %v268_v58 = vld [vmem:[#allocation5 + $0x68] sm:$0xff]  ;;  %1151 = vmatpush.msra.mxu3 %v286_v54  ;;  %v267_v61 = vld [vmem:[#allocation5 + $0x60] sm:$0xff]  ;;  %v420_v63 = vperm.slane %v1583_v57, 0  ;;  %v421_v0 = vperm.slane %v1583_v57, 1  ;;  %s896_s24 = scalar_lea.sflag [#allocation4], %s1552_s20 }
  0x3e   : > { %v284_v59 = vld [vmem:[#allocation5 + $0xe8] sm:$0xff]  ;;  %v283_v62 = vld [vmem:[#allocation5 + $0xe0] sm:$0xff]  ;;  %1136 = vmatpush.msra.mxu2 %v269_v55  ;;  %v266_v1 = vld [vmem:[#allocation5 + $0x58] sm:$0xff]  ;;  %s1357_s23 = sshra.s32 %s911_s9, 4  ;;  %s1363_s29 = scalar_lea.hbm %s1803_s4, 32  ;;  %s1358_s23 = int_to_ptr.hbm [resolvable:$true] %s1357_s23 }
  0x3f   : > { %393 = vmatpush.bf16.msra.mxu0 %v1051_v23  ;;  %1152 = vmatpush.msra.mxu3 %v285_v56  ;;  %v282_v2 = vld [vmem:[#allocation5 + $0xd8] sm:$0xff]  ;;  %v265_v4 = vld [vmem:[#allocation5 + $0x50] sm:$0xff]  ;;  %v264_v9 = vld [vmem:[#allocation5 + $0x48] sm:$0xff]  ;;  %s1359_s25 = scalar_lea.hbm %s1358_s23, 16  ;;  %p1364_p11 = scmp.lt.s32.totalorder %s1358_s23, %s1803_s4 }
  0x40   : > { %407 = vmatpush.bf16.msra.mxu1 %v1055_v25  ;;  %1137 = vmatpush.msra.mxu2 %v268_v58  ;;  %v281_v5 = vld [vmem:[#allocation5 + $0xd0] sm:$0xff]  ;;  %v280_v10 = vld [vmem:[#allocation5 + $0xc8] sm:$0xff]  ;;  %v263_v15 = vld [vmem:[#allocation5 + $0x40] sm:$0xff]  ;;  %v1590_v25 = vadd.s32 128, %v1587_v14  ;;  %p1360_p1 = scmp.ne.s32.totalorder %s1358_s23, %s1359_s25  ;;  %p1365_p2 = scmp.lt.s32.totalorder %s1363_s29, %s1359_s25 }
  0x41   : > { %291 = vadd.xlane.f32.xlu0 %v288_v37  ;;  %1153 = vmatpush.msra.mxu3 %v284_v59  ;;  %v279_v16 = vld [vmem:[#allocation5 + $0xc0] sm:$0xff]  ;;  %v262_v20 = vld [vmem:[#allocation5 + $0x38] sm:$0xff]  ;;  %v261_v26 = vld [vmem:[#allocation5 + $0x30] sm:$0xff] }
  0x42   : > { %1138 = vmatpush.msra.mxu2 %v267_v61  ;;  %v278_v21 = vld [vmem:[#allocation5 + $0xb8] sm:$0xff]  ;;  %v277_v27 = vld [vmem:[#allocation5 + $0xb0] sm:$0xff]  ;;  %v260_v33 = vld [vmem:[#allocation5 + $0x28] sm:$0xff]  ;;  %p1361_p4 = pnand %p1360_p1, %p1519_p3  ;;  %p1366_p9 = por %p1365_p2, %p1364_p11 }
  0x43   : > { %394 = vmatpush.bf16.msra.mxu0 %v1043_v30  ;;  %1154 = vmatpush.msra.mxu3 %v283_v62  ;;  %v276_v35 = vld [vmem:[#allocation5 + $0xa8] sm:$0xff]  ;;  %v259_v41 = vld [vmem:[#allocation5 + $0x20] sm:$0xff]  ;;  %v258_v46 = vld [vmem:[#allocation5 + $0x18] sm:$0xff] }
  0x44   : > { %408 = vmatpush.bf16.msra.mxu1 %v1047_v31  ;;  %1139 = vmatpush.msra.mxu2 %v266_v1  ;;  %v275_v42 = vld [vmem:[#allocation5 + $0xa0] sm:$0xff]  ;;  %v274_v47 = vld [vmem:[#allocation5 + $0x98] sm:$0xff]  ;;  %v256_v57 = vld [vmem:[#allocation5 + $0x8] sm:$0xff]  ;;  %p1362_p8 = pneg %p1361_p4 }
  0x45   : > { %1155 = vmatpush.msra.mxu3 %v282_v2 }
  0x46   : > { %1140 = vmatpush.msra.mxu2 %v265_v4  ;;  %p1367_p10 = pnand %p1366_p9, %p1362_p8 }
  0x47   : > { %395 = vmatpush.bf16.msra.mxu0 %v1035_v38  ;;  %1156 = vmatpush.msra.mxu3 %v281_v5 }
  0x48   : > { %409 = vmatpush.bf16.msra.mxu1 %v1039_v39  ;;  %1141 = vmatpush.msra.mxu2 %v264_v9 }
  0x49   : > { %1157 = vmatpush.msra.mxu3 %v280_v10 }
  0x4a   : > { %1142 = vmatpush.msra.mxu2 %v263_v15 }
  0x4b   : > { %396 = vmatpush.bf16.msra.mxu0 %v1027_v44  ;;  %1158 = vmatpush.msra.mxu3 %v279_v16 }
  0x4c   : > { %410 = vmatpush.bf16.msra.mxu1 %v1031_v45  ;;  %1143 = vmatpush.msra.mxu2 %v262_v20 }
  0x4d   : > { %1159 = vmatpush.msra.mxu3 %v278_v21 }
  0x4e   : > { %1144 = vmatpush.msra.mxu2 %v261_v26 }
  0x4f   : > { %397 = vmatpush.bf16.msra.mxu0 %v1019_v50  ;;  %1160 = vmatpush.msra.mxu3 %v277_v27  ;;  %v257_v50 = vld [vmem:[#allocation5 + $0x10] sm:$0xff] }
  0x50   : > { %411 = vmatpush.bf16.msra.mxu1 %v1023_v51  ;;  %1145 = vmatpush.msra.mxu2 %v260_v33  ;;  %v273_v51 = vld [vmem:[#allocation5 + $0x90] sm:$0xff] }
  0x51   : > { %1161 = vmatpush.msra.mxu3 %v276_v35 }
  0x52   : > { %398 = vmatmul.bf16.vlgmr.msra.gmra.mxu0 %v293_v52  ;;  %1146 = vmatpush.msra.mxu2 %v259_v41 }
  0x53   : > { %412 = vmatmul.bf16.vlgmr.msra.gmra.mxu1 %v293_v52  ;;  %559 = vmatpush.msrb.mxu0 %v270_v53 }
  0x54   : > { %600 = vmatpush.msrb.mxu1 %v286_v54  ;;  %1162 = vmatpush.msra.mxu3 %v275_v42 }
  0x55   : > { %560 = vmatpush.msrb.mxu0 %v269_v55  ;;  %1147 = vmatpush.msra.mxu2 %v258_v46 }
  0x56   : > { %601 = vmatpush.msrb.mxu1 %v285_v56  ;;  %1163 = vmatpush.msra.mxu3 %v274_v47 }
  0x57   : > { %561 = vmatpush.msrb.mxu0 %v268_v58  ;;  %1148 = vmatpush.msra.mxu2 %v257_v50  ;;  %v272_v58 = vld [vmem:[#allocation5 + $0x88] sm:$0xff] }
  0x58   : > { %602 = vmatpush.msrb.mxu1 %v284_v59  ;;  %1164 = vmatpush.msra.mxu3 %v273_v51  ;;  %v255_v59 = vld [vmem:[#allocation5] sm:$0xff] }
  0x59   : > { %562 = vmatpush.msrb.mxu0 %v267_v61  ;;  %1149 = vmatpush.msra.mxu2 %v256_v57 }
  0x5a   : > { %603 = vmatpush.msrb.mxu1 %v283_v62  ;;  %1165 = vmatpush.msra.mxu3 %v272_v58 }
  0x5b   : > { %563 = vmatpush.msrb.mxu0 %v266_v1  ;;  %1150 = vmatpush.msra.mxu2 %v255_v59 }
  0x5c   : > { %604 = vmatpush.msrb.mxu1 %v282_v2 }
  0x5d   : > { %564 = vmatpush.msrb.mxu0 %v265_v4 }
  0x5e   : > { %605 = vmatpush.msrb.mxu1 %v281_v5 }
  0x5f   : > { %565 = vmatpush.msrb.mxu0 %v264_v9 }
  0x60   : > { %606 = vmatpush.msrb.mxu1 %v280_v10 }
  0x61   : > { %566 = vmatpush.msrb.mxu0 %v263_v15 }
  0x62   : > { %607 = vmatpush.msrb.mxu1 %v279_v16 }
  0x63   : > { %567 = vmatpush.msrb.mxu0 %v262_v20 }
  0x64   : > { %608 = vmatpush.msrb.mxu1 %v278_v21 }
  0x65   : > { %568 = vmatpush.msrb.mxu0 %v261_v26 }
  0x66   : > { %609 = vmatpush.msrb.mxu1 %v277_v27 }
  0x67   : > { %569 = vmatpush.msrb.mxu0 %v260_v33 }
  0x68   : > { %610 = vmatpush.msrb.mxu1 %v276_v35 }
  0x69   : > { %570 = vmatpush.msrb.mxu0 %v259_v41 }
  0x6a   : > { %611 = vmatpush.msrb.mxu1 %v275_v42 }
  0x6b   : > { %571 = vmatpush.msrb.mxu0 %v258_v46 }
  0x6c   : > { %612 = vmatpush.msrb.mxu1 %v274_v47 }
  0x6d   : > { %572 = vmatpush.msrb.mxu0 %v257_v50 }
  0x6e   : > { %613 = vmatpush.msrb.mxu1 %v273_v51 }
  0x6f   : > { %573 = vmatpush.msrb.mxu0 %v256_v57 }
  0x70   : > { %614 = vmatpush.msrb.mxu1 %v272_v58 }
  0x71   : > { %574 = vmatpush.msrb.mxu0 %v255_v59 }
  0xac   : > { %v290_v60 = vpop.xlane.xlu0 %289 }
  0xad   : > { %v424_v6 = vadd.f32 %v420_v63, %v290_v60  ;;  %v425_v8 = vadd.f32 %v421_v0, %v290_v60  ;;  %v271_v60 = vld [vmem:[#allocation5 + $0x80] sm:$0xff] }
  0xae   : > { %615 = vmatpush.msrb.mxu1 %v271_v60  ;;  %1166 = vmatpush.msra.mxu3 %v271_v60 }
  0xb4   : > { %v292_v19 = vpop.xlane.xlu0 %291 }
  0xb5   : > { %v426_v28 = vadd.f32 %v420_v63, %v292_v19  ;;  %v427_v31 = vadd.f32 %v421_v0, %v292_v19  ;;  %v1419_v63 = vmov 1.0  }
  0xcf   : > { %v399_v7 = vpop.f32.mrf.mxu0 }
  0xd0   : > { %v428_v11 = vmul.f32 2.0, %v399_v7  ;;  %v413_v12 = vpop.f32.mrf.mxu1 }
  0xd1   : > { %v429_v13 = vmul.f32 2.0, %v413_v12 }
  0xd2   : > { %v432_v17 = vsub.f32 %v424_v6, %v428_v11 }
  0xd3   : > { %v433_v18 = vsub.f32 %v425_v8, %v429_v13 }
  0xd4   : > { %v436_v23 = vadd.f32 1.0, %v432_v17 }
  0xd5   : > { %v437_v24 = vadd.f32 1.0, %v433_v18 }
  0xd6   : > { %v447_v29 = vand.u32 4294967040, %v436_v23 }
  0xd7   : > { %v401_v30 = vpop.f32.mrf.mxu0  ;;  %v448_v32 = vand.u32 4294967040, %v437_v24 }
  0xd8   : > { %v430_v36 = vmul.f32 2.0, %v401_v30  ;;  %v415_v37 = vpop.f32.mrf.mxu1  ;;  %v451_v38 = vor.u32 %v447_v29, %v1587_v14 }
  0xd9   : > { %v431_v39 = vmul.f32 2.0, %v415_v37  ;;  %v452_v40 = vor.u32 %v448_v32, %v1590_v25 }
  0xda   : > { %v434_v43 = vsub.f32 %v426_v28, %v430_v36 }
  0xdb   : > { %v435_v44 = vsub.f32 %v427_v31, %v431_v39  ;;  %v459_v45 = vmin.f32 %v451_v38, %v452_v40 }
  0xdc   : > { %v438_v48 = vadd.f32 1.0, %v434_v43 }
  0xdd   : > { %v439_v49 = vadd.f32 1.0, %v435_v44  ;;  %460 = vmin.xlane.f32.xlu1 %v459_v45 }
  0xde   : > { %v449_v52 = vand.u32 4294967040, %v438_v48 }
  0xdf   : > { %v450_v53 = vand.u32 4294967040, %v439_v49 }
  0xe0   : > { %v453_v54 = vor.u32 %v449_v52, %v1587_v14 }
  0xe1   : > { %v454_v55 = vor.u32 %v450_v53, %v1590_v25 }
  0xe3   : > { %v462_v56 = vmin.f32 %v453_v54, %v454_v55 }
  0xe5   : > { %463 = vmin.xlane.f32.xlu1 %v462_v56 }
 0x150   : > { %v461_v61 = vpop.xlane.xlu1 %460 }
 0x151   : > { %v467_v62 = vand.u32 255, %v461_v61 }
 0x153   : > { %vm469_vm0 = vcmp.eq.s32.totalorder %v1587_v14, %v467_v62  ;;  %vm470_vm1 = vcmp.eq.s32.totalorder %v1590_v25, %v467_v62 }
 0x154   : > { %1096 = vmatmul.msk.f32.vlgmr.msrb.gmra.mxu0 %vm469_vm0, %v1419_v63  ;;  %1104 = vmatmul.msk.f32.vlgmr.msrb.gmra.mxu1 %vm470_vm1, %v1419_v63  ;;  %v481_v0 = vsel %vm469_vm0, inf, %v451_v38  ;;  %v482_v1 = vsel %vm470_vm1, inf, %v452_v40 }
 0x155   : > { %v485_v2 = vmin.f32 %v481_v0, %v482_v1 }
 0x157   : > { %486 = vmin.xlane.f32.xlu2 %v485_v2 }
 0x158   : > { %v464_v3 = vpop.xlane.xlu1 %463 }
 0x159   : > { %v468_v4 = vand.u32 255, %v464_v3 }
 0x15b   : > { %vm471_vm2 = vcmp.eq.s32.totalorder %v1587_v14, %v468_v4  ;;  %vm472_vm3 = vcmp.eq.s32.totalorder %v1590_v25, %v468_v4 }
 0x15c   : > { %1097 = vmatmul.msk.f32.gmra.mxu0 %vm471_vm2, %v1419_v63  ;;  %1105 = vmatmul.msk.f32.gmra.mxu1 %vm472_vm3, %v1419_v63  ;;  %v483_v5 = vsel %vm471_vm2, inf, %v453_v54  ;;  %v484_v6 = vsel %vm472_vm3, inf, %v454_v55 }
 0x15d   : > { %v488_v7 = vmin.f32 %v483_v5, %v484_v6 }
 0x15f   : > { %489 = vmin.xlane.f32.xlu2 %v488_v7 }
 0x1ca   : > { %v487_v8 = vpop.xlane.xlu2 %486 }
 0x1cb   : > { %v493_v9 = vand.u32 255, %v487_v8 }
 0x1cd   : > { %vm495_vm4 = vcmp.eq.s32.totalorder %v1587_v14, %v493_v9  ;;  %vm496_vm5 = vcmp.eq.s32.totalorder %v1590_v25, %v493_v9 }
 0x1ce   : > { %1098 = vmatmul.msk.f32.vlgmr.msra.gmra.mxu2 %vm495_vm4, %v1419_v63  ;;  %1106 = vmatmul.msk.f32.vlgmr.msra.gmra.mxu3 %vm496_vm5, %v1419_v63  ;;  %v507_v10 = vsel %vm495_vm4, inf, %v481_v0  ;;  %v508_v11 = vsel %vm496_vm5, inf, %v482_v1 }
 0x1cf   : > { %v511_v12 = vmin.f32 %v507_v10, %v508_v11 }
 0x1d1   : > { %512 = vmin.xlane.f32.xlu0 %v511_v12  ;;  %v576_v27 = vpop.f32.mrf.mxu0  ;;  %v617_v28 = vpop.f32.mrf.mxu1 }
 0x1d2   : > { %v490_v13 = vpop.xlane.xlu2 %489  ;;  %v1620_v36 = vadd.f32 %v617_v28, %v576_v27 }
 0x1d3   : > { %v494_v15 = vand.u32 255, %v490_v13 }
 0x1d4   : > { %v641_v9 = vsub.f32 %v1569_v22, %v1620_v36 }
 0x1d5   : > { %vm497_vm6 = vcmp.eq.s32.totalorder %v1587_v14, %v494_v15  ;;  %vm498_vm7 = vcmp.eq.s32.totalorder %v1590_v25, %v494_v15 }
 0x1d6   : > { %1099 = vmatmul.msk.f32.gmra.mxu2 %vm497_vm6, %v1419_v63  ;;  %1107 = vmatmul.msk.f32.gmra.mxu3 %vm498_vm7, %v1419_v63  ;;  %v509_v16 = vsel %vm497_vm6, inf, %v483_v5  ;;  %v510_v17 = vsel %vm498_vm7, inf, %v484_v6 }
 0x1d7   : > { %v514_v18 = vmin.f32 %v509_v16, %v510_v17 }
 0x1d9   : > { %515 = vmin.xlane.f32.xlu1 %v514_v18  ;;  %v579_v40 = vpop.f32.mrf.mxu0  ;;  %v620_v41 = vpop.f32.mrf.mxu1 }
 0x1da   : > { %v1626_v44 = vadd.f32 %v620_v41, %v579_v40 }
 0x1dc   : > { %v642_v13 = vsub.f32 %v1574_v34, %v1626_v44 }
 0x244   : > { %v513_v19 = vpop.xlane.xlu0 %512 }
 0x245   : > { %v519_v20 = vand.u32 255, %v513_v19 }
 0x247   : > { %vm521_vm8 = vcmp.eq.s32.totalorder %v1587_v14, %v519_v20  ;;  %vm522_vm9 = vcmp.eq.s32.totalorder %v1590_v25, %v519_v20 }
 0x248   : > { %1100 = vmatmul.msk.f32.gmra.mxu2 %vm521_vm8, %v1419_v63  ;;  %1108 = vmatmul.msk.f32.gmra.mxu3 %vm522_vm9, %v1419_v63  ;;  %v533_v21 = vsel %vm521_vm8, inf, %v507_v10  ;;  %v534_v23 = vsel %vm522_vm9, inf, %v508_v11 }
 0x249   : > { %v537_v24 = vmin.f32 %v533_v21, %v534_v23 }
 0x24b   : > { %538 = vmin.xlane.f32.xlu2 %v537_v24 }
 0x24c   : > { %v516_v26 = vpop.xlane.xlu1 %515 }
 0x24d   : > { %v520_v29 = vand.u32 255, %v516_v26 }
 0x24f   : > { %vm523_vm10 = vcmp.eq.s32.totalorder %v1587_v14, %v520_v29  ;;  %vm524_vm11 = vcmp.eq.s32.totalorder %v1590_v25, %v520_v29 }
 0x250   : > { %1101 = vmatmul.msk.f32.gmra.mxu2 %vm523_vm10, %v1419_v63  ;;  %1109 = vmatmul.msk.f32.gmra.mxu3 %vm524_vm11, %v1419_v63  ;;  %v535_v30 = vsel %vm523_vm10, inf, %v509_v16  ;;  %v536_v31 = vsel %vm524_vm11, inf, %v510_v17 }
 0x251   : > { %v582_v32 = vpop.f32.mrf.mxu2  ;;  %v623_v33 = vpop.f32.mrf.mxu3  ;;  %v540_v35 = vmin.f32 %v535_v30, %v536_v31 }
 0x252   : > { %v1622_v37 = vadd.f32 %v623_v33, %v582_v32 }
 0x253   : > { %541 = vmin.xlane.f32.xlu0 %v540_v35 }
 0x254   : > { %v643_v38 = vsub.f32 %v1622_v37, %v1620_v36 }
 0x256   : > { %v649_v39 = vmul.f32 %v643_v38, %v643_v38  ;;  %v685_v12 = vmul.f32 %v643_v38, %v641_v9 }
 0x258   : > { %651 = vadd.xlane.f32.xlu1 %v649_v39 }
 0x259   : > { %v585_v42 = vpop.f32.mrf.mxu2  ;;  %v626_v43 = vpop.f32.mrf.mxu3 }
 0x25a   : > { %v1628_v45 = vadd.f32 %v626_v43, %v585_v42 }
 0x25c   : > { %v644_v46 = vsub.f32 %v1628_v45, %v1626_v44 }
 0x25e   : > { %v650_v47 = vmul.f32 %v644_v46, %v644_v46  ;;  %v686_v15 = vmul.f32 %v644_v46, %v642_v13 }
 0x260   : > { %653 = vadd.xlane.f32.xlu2 %v650_v47 }
 0x2be   : > { %v539_v48 = vpop.xlane.xlu2 %538 }
 0x2bf   : > { %v545_v49 = vand.u32 255, %v539_v48 }
 0x2c1   : > { %vm547_vm12 = vcmp.eq.s32.totalorder %v1587_v14, %v545_v49  ;;  %vm548_vm13 = vcmp.eq.s32.totalorder %v1590_v25, %v545_v49 }
 0x2c2   : > { %1102 = vmatmul.msk.f32.gmra.mxu2 %vm547_vm12, %v1419_v63  ;;  %1110 = vmatmul.msk.f32.gmra.mxu3 %vm548_vm13, %v1419_v63 }
 0x2c6   : > { %v542_v50 = vpop.xlane.xlu0 %541 }
 0x2c7   : > { %v546_v51 = vand.u32 255, %v542_v50 }
 0x2c9   : > { %vm549_vm14 = vcmp.eq.s32.totalorder %v1587_v14, %v546_v51  ;;  %vm550_vm15 = vcmp.eq.s32.totalorder %v1590_v25, %v546_v51 }
 0x2ca   : > { %1103 = vmatmul.msk.f32.gmra.mxu2 %vm549_vm14, %v1419_v63  ;;  %1111 = vmatmul.msk.f32.gmra.mxu3 %vm550_vm15, %v1419_v63 }
 0x2cb   : > { %v588_v52 = vpop.f32.mrf.mxu2  ;;  %v629_v53 = vpop.f32.mrf.mxu3 }
 0x2cc   : > { %v1640_v54 = vadd.f32 %v629_v53, %v588_v52  ;;  %v652_v21 = vpop.xlane.xlu1 %651 }
 0x2ce   : > { %v645_v55 = vsub.f32 %v1640_v54, %v1620_v36 }
 0x2d0   : > { %v667_v56 = vmul.f32 %v645_v55, %v645_v55  ;;  %v655_v60 = vmul.f32 %v645_v55, %v643_v38  ;;  %v691_v19 = vmul.f32 %v645_v55, %v641_v9 }
 0x2d2   : > { %669 = vadd.xlane.f32.xlu0 %v667_v56 }
 0x2d3   : > { %v591_v57 = vpop.f32.mrf.mxu2  ;;  %v632_v58 = vpop.f32.mrf.mxu3 }
 0x2d4   : > { %v1644_v59 = vadd.f32 %v632_v58, %v591_v57  ;;  %v654_v20 = vpop.xlane.xlu2 %653 }
 0x2d6   : > { %v646_v14 = vsub.f32 %v1644_v59, %v1626_v44 }
 0x2d8   : > { %v668_v25 = vmul.f32 %v646_v14, %v646_v14  ;;  %v656_v6 = vmul.f32 %v646_v14, %v644_v46  ;;  %v692_v17 = vmul.f32 %v646_v14, %v642_v13 }
 0x2da   : > { %671 = vadd.xlane.f32.xlu1 %v668_v25 }
 0x2e2   : > { %657 = vadd.xlane.f32.xlu1 %v655_v60 }
 0x345   : > { %v594_v61 = vpop.f32.mrf.mxu2  ;;  %v635_v62 = vpop.f32.mrf.mxu3 }
 0x346   : > { %v1648_v63 = vadd.f32 %v635_v62, %v594_v61  ;;  %v670_v23 = vpop.xlane.xlu0 %669 }
 0x347   : > { %v703_v24 = vadd.f32 %v670_v23, %v652_v21 }
 0x348   : > { %v647_v0 = vsub.f32 %v1648_v63, %v1620_v36 }
 0x34a   : > { %v679_v1 = vmul.f32 %v647_v0, %v647_v0  ;;  %v673_v10 = vmul.f32 %v647_v0, %v645_v55  ;;  %v661_v11 = vmul.f32 %v647_v0, %v643_v38  ;;  %v697_v18 = vmul.f32 %v647_v0, %v641_v9 }
 0x34c   : > { %681 = vadd.xlane.f32.xlu2 %v679_v1 }
 0x34d   : > { %v597_v2 = vpop.f32.mrf.mxu2  ;;  %v638_v3 = vpop.f32.mrf.mxu3 }
 0x34e   : > { %v1652_v4 = vadd.f32 %v638_v3, %v597_v2  ;;  %v672_v28 = vpop.xlane.xlu1 %671 }
 0x34f   : > { %v704_v30 = vadd.f32 %v672_v28, %v654_v20 }
 0x350   : > { %v648_v5 = vsub.f32 %v1652_v4, %v1626_v44 }
 0x352   : > { %v680_v7 = vmul.f32 %v648_v5, %v648_v5  ;;  %v662_v8 = vmul.f32 %v648_v5, %v644_v46  ;;  %v674_v16 = vmul.f32 %v648_v5, %v646_v14  ;;  %v698_v22 = vmul.f32 %v648_v5, %v642_v13 }
 0x354   : > { %659 = vadd.xlane.f32.xlu2 %v656_v6  ;;  %683 = vadd.xlane.f32.xlu0 %v680_v7 }
 0x355   : > { %665 = vadd.xlane.f32.xlu1 %v662_v8 }
 0x356   : > { %v1672_v53 = vpop.xlane.xlu1 %657 }
 0x35c   : > { %675 = vadd.xlane.f32.xlu2 %v673_v10  ;;  %663 = vadd.xlane.f32.xlu0 %v661_v11 }
 0x35d   : > { %687 = vadd.xlane.f32.xlu1 %v685_v12 }
 0x364   : > { %689 = vadd.xlane.f32.xlu2 %v686_v15  ;;  %677 = vadd.xlane.f32.xlu0 %v674_v16 }
 0x365   : > { %695 = vadd.xlane.f32.xlu1 %v692_v17 }
 0x36c   : > { %699 = vadd.xlane.f32.xlu2 %v697_v18  ;;  %693 = vadd.xlane.f32.xlu0 %v691_v19 }
 0x374   : > { %701 = vadd.xlane.f32.xlu0 %v698_v22 }
 0x3bf   : > { %v1660_v26 = vpop.xlane.xlu2 %681 }
 0x3c0   : > { %v705_v34 = vadd.f32 %v703_v24, %v1660_v26 }
 0x3c2   : > { %v707_v27 = vmul.f32 3.3333333e-07, %v705_v34 }
 0x3c4   : > { %v1663_v29 = vadd.f32 1e-20, %v707_v27 }
 0x3c6   : > { %v711_v31 = vadd.f32 %v1663_v29, %v652_v21  ;;  %v713_v58 = vadd.f32 %v1663_v29, %v670_v23 }
 0x3c7   : > { %v1666_v32 = vpop.xlane.xlu0 %683  ;;  %v1683_v3 = vpop.xlane.xlu2 %659 }
 0x3c8   : > { %1239 = vrcp.f32 %v711_v31  ;;  %v706_v33 = vadd.f32 %v704_v30, %v1666_v32  ;;  %v728_v43 = vand.u32 2147483648, %v711_v31  ;;  %v726_v47 = vand.u32 2147483647, %v711_v31  ;;  %v1700_v17 = vpop.xlane.xlu1 %665 }
 0x3c9   : > { %vm722_vm1 = vweird.f32 %v711_v31 }
 0x3ca   : > { %v708_v35 = vmul.f32 3.3333333e-07, %v706_v33  ;;  %v729_v50 = vor.u32 1.1754944e-38, %v728_v43  ;;  %vm727_vm3 = vcmp.eq.f32.partialorder %v726_v47, 8.507059e+37 }
 0x3cc   : > { %v1669_v38 = vadd.f32 1e-20, %v708_v35 }
 0x3ce   : > { %v1240_v39 = vpop.eup %1239  ;;  %v712_v40 = vadd.f32 %v1669_v38, %v654_v20  ;;  %v714_v7 = vadd.f32 %v1669_v38, %v672_v28 }
 0x3cf   : > { %v718_v41 = vmul.f32 %v1240_v39, %v711_v31  ;;  %vm723_vm0 = vweird.f32 %v1240_v39  ;;  %v1694_v9 = vpop.xlane.xlu0 %663  ;;  %v676_v20 = vpop.xlane.xlu2 %675 }
 0x3d0   : > { %1241 = vrcp.f32 %v712_v40  ;;  %vm724_vm2 = vmor %vm722_vm1, %vm723_vm0  ;;  %v743_v14 = vand.u32 2147483648, %v712_v40  ;;  %v741_v61 = vand.u32 2147483647, %v712_v40  ;;  %vm737_vm5 = vweird.f32 %v712_v40 }
 0x3d1   : > { %v719_v42 = vsub.f32 1.0, %v718_v41 }
 0x3d2   : > { %v744_v1 = vor.u32 1.1754944e-38, %v743_v14  ;;  %vm742_vm7 = vcmp.eq.f32.partialorder %v741_v61, 8.507059e+37 }
 0x3d3   : > { %v720_v46 = vmul.f32 %v1240_v39, %v719_v42 }
 0x3d5   : > { %v721_v48 = vadd.f32 %v1240_v39, %v720_v46 }
 0x3d6   : > { %v1242_v49 = vpop.eup %1241 }
 0x3d7   : > { %v725_v51 = vsel %vm724_vm2, %v1240_v39, %v721_v48  ;;  %v733_v52 = vmul.f32 %v1242_v49, %v712_v40  ;;  %vm738_vm4 = vweird.f32 %v1242_v49  ;;  %v678_v31 = vpop.xlane.xlu0 %677  ;;  %v715_v39 = vadd.f32 %v1663_v29, %v1660_v26 }
 0x3d8   : > { %v1674_v55 = vsel %vm727_vm3, %v729_v50, %v725_v51  ;;  %vm739_vm6 = vmor %vm737_vm5, %vm738_vm4 }
 0x3d9   : > { %v1678_v56 = vmul.f32 %v1674_v55, %v1672_v53  ;;  %v734_v57 = vsub.f32 1.0, %v733_v52  ;;  %v1698_v12 = vmul.f32 %v1674_v55, %v1694_v9  ;;  %v688_v52 = vpop.xlane.xlu1 %687 }
 0x3db   : > { %v753_v25 = vmul.f32 %v1678_v56, %v1672_v53  ;;  %v735_v60 = vmul.f32 %v1242_v49, %v734_v57  ;;  %v757_v18 = vmul.f32 %v1698_v12, %v1672_v53  ;;  %v765_v21 = vmul.f32 %v1678_v56, %v1694_v9 }
 0x3dc   : > { %v769_v34 = vmul.f32 %v1698_v12, %v1694_v9 }
 0x3dd   : > { %v755_v62 = vsub.f32 %v713_v58, %v753_v25  ;;  %v736_v0 = vadd.f32 %v1242_v49, %v735_v60  ;;  %v759_v33 = vsub.f32 %v676_v20, %v757_v18  ;;  %v767_v41 = vsub.f32 %v676_v20, %v765_v21  ;;  %v690_v60 = vpop.xlane.xlu2 %689 }
 0x3de   : > { %v771_v46 = vsub.f32 %v715_v39, %v769_v34  ;;  %v1722_v58 = vmul.f32 %v1674_v55, %v688_v52 }
 0x3df   : > { %1243 = vrcp.f32 %v755_v62  ;;  %v740_v2 = vsel %vm739_vm6, %v1242_v49, %v736_v0  ;;  %v788_v16 = vand.u32 2147483648, %v755_v62  ;;  %v786_v22 = vand.u32 2147483647, %v755_v62 }
 0x3e0   : > { %v1685_v5 = vsel %vm742_vm7, %v744_v1, %v740_v2  ;;  %vm782_vm9 = vweird.f32 %v755_v62  ;;  %v716_v1 = vadd.f32 %v1669_v38, %v1666_v32  ;;  %v761_v55 = vmul.f32 %v1722_v58, %v1672_v53 }
 0x3e1   : > { %v1689_v6 = vmul.f32 %v1685_v5, %v1683_v3  ;;  %v1710_v27 = vmul.f32 %v1685_v5, %v1700_v17  ;;  %v789_v28 = vor.u32 1.1754944e-38, %v788_v16  ;;  %vm787_vm11 = vcmp.eq.f32.partialorder %v786_v22, 8.507059e+37 }
 0x3e2   : > { %v773_v53 = vmul.f32 %v1722_v58, %v1694_v9 }
 0x3e3   : > { %v754_v8 = vmul.f32 %v1689_v6, %v1683_v3  ;;  %v758_v48 = vmul.f32 %v1710_v27, %v1683_v3  ;;  %v766_v26 = vmul.f32 %v1689_v6, %v1700_v17  ;;  %v770_v14 = vmul.f32 %v1710_v27, %v1700_v17 }
 0x3e5   : > { %v1244_v10 = vpop.eup %1243  ;;  %v756_v11 = vsub.f32 %v714_v7, %v754_v8  ;;  %v768_v2 = vsub.f32 %v678_v31, %v766_v26  ;;  %v694_v8 = vpop.xlane.xlu0 %693 }
 0x3e6   : > { %v778_v13 = vmul.f32 %v1244_v10, %v755_v62  ;;  %vm783_vm8 = vweird.f32 %v1244_v10  ;;  %v760_v62 = vsub.f32 %v678_v31, %v758_v48  ;;  %v700_v20 = vpop.xlane.xlu2 %699 }
 0x3e7   : > { %1245 = vrcp.f32 %v756_v11  ;;  %vm784_vm10 = vmor %vm782_vm9, %vm783_vm8  ;;  %v803_v47 = vand.u32 2147483648, %v756_v11  ;;  %v801_v50 = vand.u32 2147483647, %v756_v11  ;;  %vm797_vm13 = vweird.f32 %v756_v11 }
 0x3e8   : > { %v779_v15 = vsub.f32 1.0, %v778_v13 }
 0x3e9   : > { %v804_v25 = vor.u32 1.1754944e-38, %v803_v47  ;;  %vm802_vm15 = vcmp.eq.f32.partialorder %v801_v50, 8.507059e+37 }
 0x3ea   : > { %v780_v19 = vmul.f32 %v1244_v10, %v779_v15  ;;  %v763_v15 = vsub.f32 %v694_v8, %v761_v55 }
 0x3ec   : > { %v781_v23 = vadd.f32 %v1244_v10, %v780_v19 }
 0x3ed   : > { %v1246_v24 = vpop.eup %1245 }
 0x3ee   : > { %v793_v30 = vmul.f32 %v1246_v24, %v756_v11  ;;  %v785_v35 = vsel %vm784_vm10, %v1244_v10, %v781_v23  ;;  %vm798_vm12 = vweird.f32 %v1246_v24  ;;  %v1733_v10 = vmul.f32 %v1685_v5, %v690_v60  ;;  %v696_v5 = vpop.xlane.xlu1 %695 }
 0x3ef   : > { %v790_v40 = vsel %vm787_vm11, %v789_v28, %v785_v35  ;;  %vm799_vm14 = vmor %vm797_vm13, %vm798_vm12  ;;  %v772_v11 = vsub.f32 %v716_v1, %v770_v14 }
 0x3f0   : > { %v794_v42 = vsub.f32 1.0, %v793_v30  ;;  %v1714_v43 = vmul.f32 %v790_v40, %v759_v33  ;;  %v809_v22 = vmul.f32 %v790_v40, %v763_v15  ;;  %v762_v32 = vmul.f32 %v1733_v10, %v1683_v3 }
 0x3f1   : > { %v775_v30 = vsub.f32 %v700_v20, %v773_v53 }
 0x3f2   : > { %v795_v49 = vmul.f32 %v1246_v24, %v794_v42  ;;  %v819_v51 = vmul.f32 %v1714_v43, %v767_v41  ;;  %v823_v34 = vmul.f32 %v809_v22, %v767_v41  ;;  %v764_v28 = vsub.f32 %v696_v5, %v762_v32 }
 0x3f3   : > { %v811_v31 = vmul.f32 %v1714_v43, %v1678_v56  ;;  %v815_v40 = vmul.f32 %v809_v22, %v1678_v56 }
 0x3f4   : > { %v796_v57 = vadd.f32 %v1246_v24, %v795_v49  ;;  %v821_v29 = vsub.f32 %v771_v46, %v819_v51  ;;  %v825_v42 = vsub.f32 %v775_v30, %v823_v34  ;;  %v774_v49 = vmul.f32 %v1733_v10, %v1700_v17  ;;  %v702_v51 = vpop.xlane.xlu0 %701 }
 0x3f5   : > { %v813_v41 = vsub.f32 %v1698_v12, %v811_v31 }
 0x3f6   : > { %v800_v61 = vsel %vm799_vm14, %v1246_v24, %v796_v57  ;;  %1247 = vrcp.f32 %v821_v29  ;;  %v838_v21 = vand.u32 2147483648, %v821_v29  ;;  %v836_v24 = vand.u32 2147483647, %v821_v29 }
 0x3f7   : > { %v805_v0 = vsel %vm802_vm15, %v804_v25, %v800_v61  ;;  %vm832_vm1 = vweird.f32 %v821_v29  ;;  %v817_v57 = vsub.f32 %v1722_v58, %v815_v40  ;;  %v776_v12 = vsub.f32 %v702_v51, %v774_v49 }
 0x3f8   : > { %v1728_v7 = vmul.f32 %v805_v0, %v760_v62  ;;  %v810_v35 = vmul.f32 %v805_v0, %v764_v28  ;;  %v839_v39 = vor.u32 1.1754944e-38, %v838_v21  ;;  %vm837_vm3 = vcmp.eq.f32.partialorder %v836_v24, 8.507059e+37 }
 0x3fa   : > { %v820_v13 = vmul.f32 %v1728_v7, %v768_v2  ;;  %v824_v52 = vmul.f32 %v810_v35, %v768_v2  ;;  %v812_v60 = vmul.f32 %v1728_v7, %v1689_v6  ;;  %v816_v17 = vmul.f32 %v810_v35, %v1689_v6 }
 0x3fc   : > { %v1248_v16 = vpop.eup %1247  ;;  %v822_v18 = vsub.f32 %v772_v11, %v820_v13  ;;  %v826_v8 = vsub.f32 %v776_v12, %v824_v52  ;;  %v818_v15 = vsub.f32 %v1733_v10, %v816_v17 }
 0x3fd   : > { %v828_v19 = vmul.f32 %v1248_v16, %v821_v29  ;;  %vm833_vm0 = vweird.f32 %v1248_v16 }
 0x3fe   : > { %1249 = vrcp.f32 %v822_v18  ;;  %vm834_vm2 = vmor %vm832_vm1, %vm833_vm0  ;;  %v851_v26 = vand.u32 2147483647, %v822_v18  ;;  %v853_v29 = vand.u32 2147483648, %v822_v18  ;;  %vm847_vm5 = vweird.f32 %v822_v18 }
 0x3ff   : > { %v829_v38 = vsub.f32 1.0, %v828_v19 }
 0x400   : > { %v854_v1 = vor.u32 1.1754944e-38, %v853_v29  ;;  %vm852_vm7 = vcmp.eq.f32.partialorder %v851_v26, 8.507059e+37 }
 0x401   : > { %v830_v23 = vmul.f32 %v1248_v16, %v829_v38 }
 0x403   : > { %v831_v33 = vadd.f32 %v1248_v16, %v830_v23  ;;  %v1251_v23 = vld [vmem:[%s1558_s12] sm:$0xff] }
 0x404   : > { %v1250_v3 = vpop.eup %1249  ;;  %v887_v24 = vmul.f32 0.5, %v1251_v23 }
 0x405   : > { %v835_v9 = vsel %vm834_vm2, %v1248_v16, %v831_v33  ;;  %v843_v46 = vmul.f32 %v1250_v3, %v822_v18  ;;  %vm848_vm4 = vweird.f32 %v1250_v3 }
 0x406   : > { %v840_v47 = vsel %vm837_vm3, %v839_v39, %v835_v9  ;;  %vm849_vm6 = vmor %vm847_vm5, %vm848_vm4 }
 0x407   : > { %v857_v48 = vmul.f32 %v840_v47, %v825_v42  ;;  %v844_v50 = vsub.f32 1.0, %v843_v46 }
 0x409   : > { %v859_v14 = vmul.f32 %v857_v48, %v813_v41  ;;  %v863_v56 = vmul.f32 %v857_v48, %v1714_v43  ;;  %v845_v25 = vmul.f32 %v1250_v3, %v844_v50  ;;  %v814_v43 = vsub.f32 %v1710_v27, %v812_v60 }
 0x40a   : > { %v883_v5 = vmul.f32 %v857_v48, %v1648_v63 }
 0x40b   : > { %v861_v61 = vsub.f32 %v817_v57, %v859_v14  ;;  %v865_v62 = vsub.f32 %v809_v22, %v863_v56  ;;  %v846_v0 = vadd.f32 %v1250_v3, %v845_v25 }
 0x40d   : > { %v867_v58 = vadd.f32 %v865_v62, %v861_v61  ;;  %v850_v2 = vsel %vm849_vm6, %v1250_v3, %v846_v0  ;;  %v875_v22 = vmul.f32 %v861_v61, %v1622_v37  ;;  %v879_v53 = vmul.f32 %v865_v62, %v1640_v54 }
 0x40e   : > { %v855_v55 = vsel %vm852_vm7, %v854_v1, %v850_v2 }
 0x40f   : > { %v869_v11 = vadd.f32 %v867_v58, %v857_v48  ;;  %v858_v13 = vmul.f32 %v855_v55, %v826_v8 }
 0x411   : > { %v871_v16 = vsub.f32 1.0, %v869_v11  ;;  %v860_v19 = vmul.f32 %v858_v13, %v814_v43  ;;  %v864_v18 = vmul.f32 %v858_v13, %v1728_v7  ;;  %v884_v33 = vmul.f32 %v858_v13, %v1652_v4 }
 0x413   : > { %v873_v6 = vmul.f32 %v871_v16, %v1620_v36  ;;  %v862_v32 = vsub.f32 %v818_v15, %v860_v19  ;;  %v866_v38 = vsub.f32 %v810_v35, %v864_v18 }
 0x415   : > { %v877_v20 = vadd.f32 %v875_v22, %v873_v6  ;;  %v868_v27 = vadd.f32 %v866_v38, %v862_v32  ;;  %v876_v28 = vmul.f32 %v862_v32, %v1628_v45  ;;  %v880_v54 = vmul.f32 %v866_v38, %v1644_v59 }
 0x417   : > { %v881_v21 = vadd.f32 %v879_v53, %v877_v20  ;;  %v870_v10 = vadd.f32 %v868_v27, %v858_v13 }
 0x419   : > { %v885_v7 = vadd.f32 %v883_v5, %v881_v21  ;;  %v872_v34 = vsub.f32 1.0, %v870_v10 }
 0x41b   : > { %v889_v36 = vmul.f32 0.5, %v885_v7  ;;  %v874_v37 = vmul.f32 %v872_v34, %v1626_v44  ;;  %v1252_v44 = vld [vmem:[%s1558_s12 + $0x8] sm:$0xff] }
 0x41c   : > { %v888_v3 = vmul.f32 0.5, %v1252_v44 }
 0x41d   : > { %v891_v30 = vadd.f32 %v889_v36, %v887_v24  ;;  %v878_v31 = vadd.f32 %v876_v28, %v874_v37 }
 0x41f   : > { %v882_v63 = vadd.f32 %v880_v54, %v878_v31  ;;  %893 = vst [vmem:[%s250_s8] sm:$0xff] %v891_v30 }
 0x421   : > { %v886_v45 = vadd.f32 %v884_v33, %v882_v63 }
 0x423   : > { %v890_v35 = vmul.f32 0.5, %v886_v45 }
 0x425   : > { %v892_v59 = vadd.f32 %v890_v35, %v888_v3 }
 0x427   : > { %894 = vst [vmem:[%s250_s8 + $0x8] sm:$0xff] %v892_v59 }
 0x428   : > { %1370 = shalt.err (!%p1367_p10)
}
 0x429   : > { %s1420_s20 = smov 128   ;;  %s1421_s21 = smov 8  }
 0x42a   : > { %1177 = dma.vmem_to_hbm [thread:$0]  (%p1519_p3), %s909_s19, 256, %s911_s9, %s896_s24, %s1420_s20, %s1420_s20, %s1421_s21  }
 0x42b PF: > { %s925_s26 = sand.u32 1, %s1401_s15   ;;  %p1809_p12 = scmp.ge.s32.totalorder %s1413_s18, 2 }
 0x42c   : > { %s926_s6 = scalar_lea.sflag [#allocation4], %s925_s26 }
 0x42d   : > { %p1191_p13 = pnand %p1809_p12, %p1482_p6 }
 0x42f   : > { %p1192_p0 = pneg %p1191_p13 }
 0x431   : > { %1396 = dma.done.wait (%p1192_p0), %s926_s6, 256  }
 0x432   : > { %1398 = vsyncadd (%p1192_p0), %s926_s6, 4294967040  ;;  %p18_p5 = scmp.ge.s32.totalorder %s1509_s10, 4   ;;  %s1810_s15 = smov %s1405_s16 }
 0x433   : > { %s1811_s16 = smov %s1409_s17  ;;  %s1812_s17 = smov %s1525_s14 }
 0x434   : > { %s1813_s18 = smov %s1509_s10  ;;  %20 = sbr.rel (!%p18_p5) target bundleno = 6 (0x6), region = 89 }
 0x439   :  { %932 = vsyncpa [#allocation3], 1 }
 0x43a   :  { %934 = vsyncpa [#allocation3 + $0x1], 1 }
 0x43b   :  { %935 = vsyncpa [#allocation6], 1 }
 0x43c   :  { %936 = vsyncpa [#allocation4], 1 }
 0x43d   :  { %938 = vsyncpa [#allocation4 + $0x1], 1 }

</bundles_post_ra>
